<compile_context>
chip_gen: v5e
topology: v5e:2x2
jax: 0.10.0
libtpu: 0.0.40
codegen_flags: <defaults>
</compile_context>

<pallas_src>
import jax
import jax.numpy as jnp
from jax.experimental import pallas as pl
from jax.experimental.pallas import tpu as pltpu


# --------------------------------------------------------------------------
# Kernel
# --------------------------------------------------------------------------
def _attention_kernel(x_ref, g_ref, wx_ref, wg_ref, bxg_ref, wp_ref, bp_ref,
                      o_ref):
    # x_ref : (B_t, F_l, TP)     g_ref : (B_t, F_g, TP)
    # wx_ref: (F_int, F_l)       wg_ref: (F_int, F_g)
    # bxg_ref: (F_int, 1)        wp_ref: (F_int, 1)     bp_ref: (1, 1) in SMEM
    # o_ref : (B_t, F_l, TP)
    wx = wx_ref[...]
    wg = wg_ref[...]
    bxg = bxg_ref[...]
    wp = wp_ref[...]
    bp = bp_ref[0, 0]

    b_t = x_ref.shape[0]           # static block size -> small unrolled loop
    for b in range(b_t):
        x = x_ref[b]                                        # (F_l, TP)
        g = g_ref[b]                                        # (F_g, TP)

        # Fused W_x(x) + W_g(g) (+ pre-summed folded-BN biases), then ReLU.
        h = jnp.dot(wx, x, preferred_element_type=jnp.float32)
        h = h + jnp.dot(wg, g, preferred_element_type=jnp.float32)
        h = jnp.maximum(h + bxg, 0.0)                       # (F_int, TP) f32

        # psi: 1-channel projection as VPU mul + sublane reduce (lane-dense).
        p = jnp.sum(h * wp, axis=0, keepdims=True) + bp     # (1, TP)
        psi = jax.nn.sigmoid(p)

        # Gate the input; psi broadcasts over the channel (sublane) axis.
        o_ref[b] = (x * psi).astype(o_ref.dtype)


# --------------------------------------------------------------------------
# Plain-JAX glue
# --------------------------------------------------------------------------
def _fold_bn(w, b, gamma, beta, mean, var, eps=1e-5):
    """Fold eval-mode BatchNorm into a 1x1 conv. w: (Cout, Cin), b: (Cout,)."""
    scale = gamma / jnp.sqrt(var + eps)
    w_f = w * scale[:, None]
    b_f = (b - mean) * scale + beta
    return w_f, b_f


def _vmem_budgets():
    """Generation-aware VMEM budgets (v7x has 64 MiB/TC vs 128 MiB on v5e/v6e)."""
    cap = 128 << 20
    try:
        cap = int(getattr(pltpu.get_tpu_info(), "vmem_capacity_bytes", cap))
    except Exception:
        pass
    if cap <= (64 << 20):   # v7x-class
        return dict(tile_budget=20 << 20, vmem_limit=48 << 20, max_tile=8192)
    # v5e / v6e: modest tiles already sit at the HBM roofline.
    return dict(tile_budget=16 << 20, vmem_limit=32 << 20, max_tile=2048)


def _pick_block(N, S, F_l, F_g, F_int, act_itemsize, out_itemsize,
                tile_budget_bytes, max_tile, tile_p_override=None):
    """Pick (batch-block, pixel-tile).  tile divides S when S % 128 == 0."""
    per_pixel = (2 * (F_l * act_itemsize + F_g * act_itemsize + F_l * out_itemsize)
                 + 4 * (F_int + 2))
    if tile_p_override is not None:
        tp = int(tile_p_override)
    else:
        budget_tp = max(128, (tile_budget_bytes // max(per_pixel, 1)) // 128 * 128)
        cand = min(budget_tp, max_tile)
        if S % 128 == 0:
            if cand >= S:
                tp = S
            else:
                tp = 128
                for k in range(cand // 128, 0, -1):      # largest 128k | S
                    if S % (k * 128) == 0:
                        tp = k * 128
                        break
        else:
            # No wrapper pad: either the whole (small) image is one block, or
            # the last pixel block is a Pallas partial block (masked stores).
            tp = S if S <= 128 else min(cand, (S // 128) * 128)

    # Small-S case: amortize per-step overhead by blocking batch images.
    bt = 1
    if tp >= S and N > 1:
        bt = max(1, min(N, 8, int(tile_budget_bytes // max(per_pixel * tp, 1))))
        while N % bt:
            bt -= 1
    return bt, tp


def attention_block(x, g, params, *, tile_p=None):
    """x: (N, F_l, H, W) NCHW, g: (N, F_g, H, W) NCHW. Returns (N, F_l, H, W)."""
    N, F_l, H, W = x.shape
    _, F_g, _, _ = g.shape
    F_int = params["wg"].shape[0]
    S = H * W
    act_dtype = x.dtype

    # Fold eval-mode BN into conv weights/biases.
    wg_f, bg_f = _fold_bn(params["wg"], params["bg"], params["bn_g_gamma"],
                          params["bn_g_beta"], params["bn_g_mean"],
                          params["bn_g_var"])
    wx_f, bx_f = _fold_bn(params["wx"], params["bx"], params["bn_x_gamma"],
                          params["bn_x_beta"], params["bn_x_mean"],
                          params["bn_x_var"])
    wp_f, bp_f = _fold_bn(params["wp"], params["bp"], params["bn_p_gamma"],
                          params["bn_p_beta"], params["bn_p_mean"],
                          params["bn_p_var"])

    # Channel-major pixel slabs: NCHW -> (N, C, H*W).  No transposes, no pad.
    x_flat = x.reshape(N, F_l, S)
    g_flat = g.reshape(N, F_g, S)

    budgets = _vmem_budgets()
    bt, tp = _pick_block(N, S, F_l, F_g, F_int,
                         jnp.dtype(act_dtype).itemsize,
                         jnp.dtype(act_dtype).itemsize,
                         budgets["tile_budget"], budgets["max_tile"], tile_p)

    # Matmul weights in the activation dtype (bf16 native MXU path if bf16);
    # biases / psi weight stay f32 (f32 accumulation + f32 sigmoid in-kernel).
    wx_m = wx_f.astype(act_dtype)                          # (F_int, F_l)
    wg_m = wg_f.astype(act_dtype)                          # (F_int, F_g)
    bxg_m = (bx_f + bg_f).reshape(F_int, 1).astype(jnp.float32)
    wp_m = wp_f.reshape(F_int, 1).astype(jnp.float32)
    bp_m = bp_f.reshape(1, 1).astype(jnp.float32)          # scalar -> SMEM

    grid = (pl.cdiv(N, bt), pl.cdiv(S, tp))

    def _run(weight_mode):
        def wspec(shape):
            if weight_mode is None:
                return pl.BlockSpec(shape, lambda n, s: (0, 0))
            return pl.BlockSpec(shape, lambda n, s: (0, 0),
                                pipeline_mode=weight_mode)

        grid_spec = pltpu.PrefetchScalarGridSpec(
            num_scalar_prefetch=0,
            grid=grid,
            in_specs=[
                pl.BlockSpec((bt, F_l, tp), lambda n, s: (n, 0, s)),   # x
                pl.BlockSpec((bt, F_g, tp), lambda n, s: (n, 0, s)),   # g
                wspec((F_int, F_l)),                                   # Wx
                wspec((F_int, F_g)),                                   # Wg
                wspec((F_int, 1)),                                     # bx+bg
                wspec((F_int, 1)),                                     # Wpsi
                pl.BlockSpec(memory_space=pltpu.MemorySpace.SMEM),     # bpsi
            ],
            out_specs=pl.BlockSpec((bt, F_l, tp), lambda n, s: (n, 0, s)),
        )
        return pl.pallas_call(
            _attention_kernel,
            out_shape=jax.ShapeDtypeStruct((N, F_l, S), act_dtype),
            grid_spec=grid_spec,
            compiler_params=pltpu.CompilerParams(
                dimension_semantics=("parallel", "parallel"),
                vmem_limit_bytes=budgets["vmem_limit"]),
        )(x_flat, g_flat, wx_m, wg_m, bxg_m, wp_m, bp_m)

    try:
        # Weights/biases have constant index maps -> single-buffer them.
        out_flat = _run(pl.Buffered(1))
    except Exception:
        # Fallback for JAX versions without BlockSpec pipeline_mode support.
        out_flat = _run(None)

    return out_flat.reshape(N, F_l, H, W)


# --------------------------------------------------------------------------
# Reference + test harness
# --------------------------------------------------------------------------
def _reference(x, g, params):
    """Pure-JAX reference mirroring the PyTorch forward (eval-mode BN)."""
    def conv1x1_bn(inp, w, b, gamma, beta, mean, var, eps=1e-5):
        y = jnp.einsum("nchw,oc->nohw", inp, w) + b[None, :, None, None]
        scale = gamma / jnp.sqrt(var + eps)
        return (y - mean[None, :, None, None]) * scale[None, :, None, None] \
            + beta[None, :, None, None]

    g1 = conv1x1_bn(g, params["wg"], params["bg"], params["bn_g_gamma"],
                    params["bn_g_beta"], params["bn_g_mean"], params["bn_g_var"])
    x1 = conv1x1_bn(x, params["wx"], params["bx"], params["bn_x_gamma"],
                    params["bn_x_beta"], params["bn_x_mean"], params["bn_x_var"])
    h = jnp.maximum(g1 + x1, 0.0)
    p = conv1x1_bn(h, params["wp"], params["bp"], params["bn_p_gamma"],
                   params["bn_p_beta"], params["bn_p_mean"], params["bn_p_var"])
    psi = jax.nn.sigmoid(p)
    return x * psi


def make_params(key, F_g, F_l, F_int):
    ks = jax.random.split(key, 6)
    return {
        # Conv2d(F_g, F_int, 1) / Conv2d(F_l, F_int, 1) / Conv2d(F_int, 1, 1)
        "wg": 0.1 * jax.random.normal(ks[0], (F_int, F_g), jnp.float32),
        "bg": 0.1 * jax.random.normal(ks[1], (F_int,), jnp.float32),
        "wx": 0.1 * jax.random.normal(ks[2], (F_int, F_l), jnp.float32),
        "bx": 0.1 * jax.random.normal(ks[3], (F_int,), jnp.float32),
        "wp": 0.1 * jax.random.normal(ks[4], (1, F_int), jnp.float32),
        "bp": 0.1 * jax.random.normal(ks[5], (1,), jnp.float32),
        # BatchNorm params / running stats (eval mode), deterministic values.
        "bn_g_gamma": jnp.linspace(0.9, 1.1, F_int, dtype=jnp.float32),
        "bn_g_beta": jnp.linspace(-0.05, 0.05, F_int, dtype=jnp.float32),
        "bn_g_mean": jnp.linspace(-0.1, 0.1, F_int, dtype=jnp.float32),
        "bn_g_var": jnp.linspace(0.8, 1.2, F_int, dtype=jnp.float32),
        "bn_x_gamma": jnp.linspace(1.05, 0.95, F_int, dtype=jnp.float32),
        "bn_x_beta": jnp.linspace(0.02, -0.02, F_int, dtype=jnp.float32),
        "bn_x_mean": jnp.linspace(0.05, -0.05, F_int, dtype=jnp.float32),
        "bn_x_var": jnp.linspace(1.1, 0.9, F_int, dtype=jnp.float32),
        "bn_p_gamma": jnp.array([1.02], jnp.float32),
        "bn_p_beta": jnp.array([0.01], jnp.float32),
        "bn_p_mean": jnp.array([0.03], jnp.float32),
        "bn_p_var": jnp.array([0.95], jnp.float32),
    }


if __name__ == "__main__":
    N, F_g, F_l, F_int, H, W = 2, 4, 4, 8, 16, 16
    key = jax.random.PRNGKey(0)
    kx, kg, kp = jax.random.split(key, 3)
    x = jax.random.normal(kx, (N, F_l, H, W), jnp.float32)
    g = jax.random.normal(kg, (N, F_g, H, W), jnp.float32)
    params = make_params(kp, F_g, F_l, F_int)

    ref = _reference(x, g, params)

    # f32, default tiling (batch-blocked: whole image fits one pixel tile).
    out = jax.block_until_ready(attention_block(x, g, params))
    assert out.shape == (N, F_l, H, W)
    assert jnp.allclose(out, ref, atol=1e-5, rtol=1e-5), "f32 mismatch"

    # f32, forced multi-step pixel grid (exercises the tiled path).
    out_t = jax.block_until_ready(attention_block(x, g, params, tile_p=128))
    assert jnp.allclose(out_t, ref, atol=1e-5, rtol=1e-5), "tiled f32 mismatch"

    # bf16 activations end-to-end (f32 accumulation / psi / sigmoid in-kernel).
    x_bf = x.astype(jnp.bfloat16)
    g_bf = g.astype(jnp.bfloat16)
    out_bf = jax.block_until_ready(attention_block(x_bf, g_bf, params))
    ref_bf = _reference(x_bf.astype(jnp.float32), g_bf.astype(jnp.float32),
                        params)
    assert out_bf.dtype == jnp.bfloat16
    assert jnp.allclose(out_bf.astype(jnp.float32), ref_bf,
                        atol=5e-2, rtol=5e-2), "bf16 mismatch"

    print("KERNEL_OK")
</pallas_src>

<mosaic_0001>
module attributes {stable_mosaic.version = 11 : i64} {
  func.func @_attention_kernel(%arg0: i32, %arg1: i32, %arg2: memref<2x4x256xf32, #tpu.memory_space<vmem>>, %arg3: memref<2x4x256xf32, #tpu.memory_space<vmem>>, %arg4: memref<8x4xf32, #tpu.memory_space<vmem>>, %arg5: memref<8x4xf32, #tpu.memory_space<vmem>>, %arg6: memref<8x1xf32, #tpu.memory_space<vmem>>, %arg7: memref<8x1xf32, #tpu.memory_space<vmem>>, %arg8: memref<1x1xf32, #tpu.memory_space<smem>>, %arg9: memref<2x4x256xf32, #tpu.memory_space<vmem>>) attributes {dimension_semantics = [#tpu.dimension_semantics<parallel>, #tpu.dimension_semantics<parallel>], iteration_bounds = array<i64: 1, 1>, scalar_prefetch = 0 : i64, scratch_operands = 0 : i64, tpu.core_type = #tpu.core_type<tc>, window_params = [{transform_indices = @transform_0, window_bounds = array<i64: 2, 4, 256>}, {transform_indices = @transform_1, window_bounds = array<i64: 2, 4, 256>}, {pipeline_mode = #tpu.pipeline_mode<synchronous>, transform_indices = @transform_2, window_bounds = array<i64: 8, 4>}, {pipeline_mode = #tpu.pipeline_mode<synchronous>, transform_indices = @transform_3, window_bounds = array<i64: 8, 4>}, {pipeline_mode = #tpu.pipeline_mode<synchronous>, transform_indices = @transform_4, window_bounds = array<i64: 8, 1>}, {pipeline_mode = #tpu.pipeline_mode<synchronous>, transform_indices = @transform_5, window_bounds = array<i64: 8, 1>}, {transform_indices = @transform_6, window_bounds = array<i64: 1, 1>}, {transform_indices = @transform_7, window_bounds = array<i64: 2, 4, 256>}]} {
    %c0 = arith.constant 0 : index
    %c0_0 = arith.constant 0 : index
    %0 = vector.load %arg4[%c0, %c0_0] : memref<8x4xf32, #tpu.memory_space<vmem>>, vector<8x4xf32>
    %c0_1 = arith.constant 0 : index
    %c0_2 = arith.constant 0 : index
    %1 = vector.load %arg5[%c0_1, %c0_2] : memref<8x4xf32, #tpu.memory_space<vmem>>, vector<8x4xf32>
    %c0_3 = arith.constant 0 : index
    %c0_4 = arith.constant 0 : index
    %2 = vector.load %arg6[%c0_3, %c0_4] : memref<8x1xf32, #tpu.memory_space<vmem>>, vector<8x1xf32>
    %c0_5 = arith.constant 0 : index
    %c0_6 = arith.constant 0 : index
    %3 = vector.load %arg7[%c0_5, %c0_6] : memref<8x1xf32, #tpu.memory_space<vmem>>, vector<8x1xf32>
    %c0_7 = arith.constant 0 : index
    %c0_8 = arith.constant 0 : index
    %4 = memref.load %arg8[%c0_7, %c0_8] : memref<1x1xf32, #tpu.memory_space<smem>>
    %c0_9 = arith.constant 0 : index
    %c0_10 = arith.constant 0 : index
    %c0_11 = arith.constant 0 : index
    %5 = vector.load %arg2[%c0_9, %c0_10, %c0_11] : memref<2x4x256xf32, #tpu.memory_space<vmem>>, vector<1x4x256xf32>
    %6 = vector.shape_cast %5 : vector<1x4x256xf32> to vector<4x256xf32>
    %c0_12 = arith.constant 0 : index
    %c0_13 = arith.constant 0 : index
    %c0_14 = arith.constant 0 : index
    %7 = vector.load %arg3[%c0_12, %c0_13, %c0_14] : memref<2x4x256xf32, #tpu.memory_space<vmem>>, vector<1x4x256xf32>
    %8 = vector.shape_cast %7 : vector<1x4x256xf32> to vector<4x256xf32>
    %cst = arith.constant dense<0.000000e+00> : vector<8x256xf32>
    %9 = tpu.matmul %0, %6, %cst {dimension_numbers = #tpu.dot_dimension_numbers<[1], [0], [0], [1], [0, 0, 1, 1], [], []>} : vector<8x4xf32>, vector<4x256xf32>, vector<8x256xf32> -> vector<8x256xf32>
    %cst_15 = arith.constant dense<0.000000e+00> : vector<8x256xf32>
    %10 = tpu.matmul %1, %8, %cst_15 {dimension_numbers = #tpu.dot_dimension_numbers<[1], [0], [0], [1], [0, 0, 1, 1], [], []>} : vector<8x4xf32>, vector<4x256xf32>, vector<8x256xf32> -> vector<8x256xf32>
    %11 = arith.addf %9, %10 : vector<8x256xf32>
    %12 = vector.broadcast %2 : vector<8x1xf32> to vector<8x256xf32>
    %13 = arith.addf %11, %12 : vector<8x256xf32>
    %cst_16 = arith.constant 0.000000e+00 : f32
    %14 = vector.broadcast %cst_16 : f32 to vector<8x256xf32>
    %15 = arith.maximumf %13, %14 : vector<8x256xf32>
    %16 = vector.broadcast %3 : vector<8x1xf32> to vector<8x256xf32>
    %17 = arith.mulf %15, %16 : vector<8x256xf32>
    %cst_17 = arith.constant dense<0.000000e+00> : vector<256xf32>
    %18 = vector.multi_reduction <add>, %17, %cst_17 [0] : vector<8x256xf32> to vector<256xf32>
    %19 = vector.shape_cast %18 : vector<256xf32> to vector<1x256xf32>
    %20 = vector.broadcast %4 : f32 to vector<1x256xf32>
    %21 = arith.addf %19, %20 : vector<1x256xf32>
    %22 = arith.negf %21 : vector<1x256xf32>
    %23 = math.exp %22 : vector<1x256xf32>
    %cst_18 = arith.constant 1.000000e+00 : f32
    %24 = vector.broadcast %cst_18 : f32 to vector<1x256xf32>
    %25 = arith.addf %24, %23 : vector<1x256xf32>
    %26 = arith.divf %24, %25 : vector<1x256xf32>
    %27 = vector.broadcast %26 : vector<1x256xf32> to vector<4x256xf32>
    %28 = arith.mulf %6, %27 : vector<4x256xf32>
    %c0_19 = arith.constant 0 : index
    %c0_20 = arith.constant 0 : index
    %c0_21 = arith.constant 0 : index
    %29 = vector.load %arg9[%c0_19, %c0_20, %c0_21] : memref<2x4x256xf32, #tpu.memory_space<vmem>>, vector<1x4x256xf32>
    %30 = vector.shape_cast %29 : vector<1x4x256xf32> to vector<4x256xf32>
    %31 = vector.shape_cast %28 : vector<4x256xf32> to vector<1x4x256xf32>
    tpu.vector_store %arg9[%c0_19, %c0_20, %c0_21], %31 {strides = array<i32>} : memref<2x4x256xf32, #tpu.memory_space<vmem>>, vector<1x4x256xf32>,
    %c1 = arith.constant 1 : index
    %c0_22 = arith.constant 0 : index
    %c0_23 = arith.constant 0 : index
    %32 = vector.load %arg2[%c1, %c0_22, %c0_23] : memref<2x4x256xf32, #tpu.memory_space<vmem>>, vector<1x4x256xf32>
    %33 = vector.shape_cast %32 : vector<1x4x256xf32> to vector<4x256xf32>
    %c1_24 = arith.constant 1 : index
    %c0_25 = arith.constant 0 : index
    %c0_26 = arith.constant 0 : index
    %34 = vector.load %arg3[%c1_24, %c0_25, %c0_26] : memref<2x4x256xf32, #tpu.memory_space<vmem>>, vector<1x4x256xf32>
    %35 = vector.shape_cast %34 : vector<1x4x256xf32> to vector<4x256xf32>
    %cst_27 = arith.constant dense<0.000000e+00> : vector<8x256xf32>
    %36 = tpu.matmul %0, %33, %cst_27 {dimension_numbers = #tpu.dot_dimension_numbers<[1], [0], [0], [1], [0, 0, 1, 1], [], []>} : vector<8x4xf32>, vector<4x256xf32>, vector<8x256xf32> -> vector<8x256xf32>
    %cst_28 = arith.constant dense<0.000000e+00> : vector<8x256xf32>
    %37 = tpu.matmul %1, %35, %cst_28 {dimension_numbers = #tpu.dot_dimension_numbers<[1], [0], [0], [1], [0, 0, 1, 1], [], []>} : vector<8x4xf32>, vector<4x256xf32>, vector<8x256xf32> -> vector<8x256xf32>
    %38 = arith.addf %36, %37 : vector<8x256xf32>
    %39 = vector.broadcast %2 : vector<8x1xf32> to vector<8x256xf32>
    %40 = arith.addf %38, %39 : vector<8x256xf32>
    %cst_29 = arith.constant 0.000000e+00 : f32
    %41 = vector.broadcast %cst_29 : f32 to vector<8x256xf32>
    %42 = arith.maximumf %40, %41 : vector<8x256xf32>
    %43 = vector.broadcast %3 : vector<8x1xf32> to vector<8x256xf32>
    %44 = arith.mulf %42, %43 : vector<8x256xf32>
    %cst_30 = arith.constant dense<0.000000e+00> : vector<256xf32>
    %45 = vector.multi_reduction <add>, %44, %cst_30 [0] : vector<8x256xf32> to vector<256xf32>
    %46 = vector.shape_cast %45 : vector<256xf32> to vector<1x256xf32>
    %47 = vector.broadcast %4 : f32 to vector<1x256xf32>
    %48 = arith.addf %46, %47 : vector<1x256xf32>
    %49 = arith.negf %48 : vector<1x256xf32>
    %50 = math.exp %49 : vector<1x256xf32>
    %cst_31 = arith.constant 1.000000e+00 : f32
    %51 = vector.broadcast %cst_31 : f32 to vector<1x256xf32>
    %52 = arith.addf %51, %50 : vector<1x256xf32>
    %53 = arith.divf %51, %52 : vector<1x256xf32>
    %54 = vector.broadcast %53 : vector<1x256xf32> to vector<4x256xf32>
    %55 = arith.mulf %33, %54 : vector<4x256xf32>
    %c1_32 = arith.constant 1 : index
    %c0_33 = arith.constant 0 : index
    %c0_34 = arith.constant 0 : index
    %56 = vector.load %arg9[%c1_32, %c0_33, %c0_34] : memref<2x4x256xf32, #tpu.memory_space<vmem>>, vector<1x4x256xf32>
    %57 = vector.shape_cast %56 : vector<1x4x256xf32> to vector<4x256xf32>
    %58 = vector.shape_cast %55 : vector<4x256xf32> to vector<1x4x256xf32>
    tpu.vector_store %arg9[%c1_32, %c0_33, %c0_34], %58 {strides = array<i32>} : memref<2x4x256xf32, #tpu.memory_space<vmem>>, vector<1x4x256xf32>,
    return
  }
  func.func @transform_0(%arg0: i32, %arg1: i32) -> (i32, i32, i32) {
    %c0_i32 = arith.constant 0 : i32
    %c0_i32_0 = arith.constant 0 : i32
    return %arg0, %c0_i32, %arg1 : i32, i32, i32
  }
  func.func @transform_1(%arg0: i32, %arg1: i32) -> (i32, i32, i32) {
    %c0_i32 = arith.constant 0 : i32
    %c0_i32_0 = arith.constant 0 : i32
    return %arg0, %c0_i32, %arg1 : i32, i32, i32
  }
  func.func @transform_2(%arg0: i32, %arg1: i32) -> (i32, i32) {
    %c0_i32 = arith.constant 0 : i32
    %c0_i32_0 = arith.constant 0 : i32
    %c0_i32_1 = arith.constant 0 : i32
    return %c0_i32, %c0_i32_0 : i32, i32
  }
  func.func @transform_3(%arg0: i32, %arg1: i32) -> (i32, i32) {
    %c0_i32 = arith.constant 0 : i32
    %c0_i32_0 = arith.constant 0 : i32
    %c0_i32_1 = arith.constant 0 : i32
    return %c0_i32, %c0_i32_0 : i32, i32
  }
  func.func @transform_4(%arg0: i32, %arg1: i32) -> (i32, i32) {
    %c0_i32 = arith.constant 0 : i32
    %c0_i32_0 = arith.constant 0 : i32
    %c0_i32_1 = arith.constant 0 : i32
    return %c0_i32, %c0_i32_0 : i32, i32
  }
  func.func @transform_5(%arg0: i32, %arg1: i32) -> (i32, i32) {
    %c0_i32 = arith.constant 0 : i32
    %c0_i32_0 = arith.constant 0 : i32
    %c0_i32_1 = arith.constant 0 : i32
    return %c0_i32, %c0_i32_0 : i32, i32
  }
  func.func @transform_6(%arg0: i32, %arg1: i32) -> (i32, i32) {
    %c0_i32 = arith.constant 0 : i32
    %c0_i32_0 = arith.constant 0 : i32
    %c0_i32_1 = arith.constant 0 : i32
    return %c0_i32, %c0_i32_0 : i32, i32
  }
  func.func @transform_7(%arg0: i32, %arg1: i32) -> (i32, i32, i32) {
    %c0_i32 = arith.constant 0 : i32
    %c0_i32_0 = arith.constant 0 : i32
    return %arg0, %c0_i32, %arg1 : i32, i32, i32
  }
}

module attributes {stable_mosaic.version = 11 : i64} {
  func.func @_attention_kernel(%arg0: i32, %arg1: i32, %arg2: memref<2x4x256xf32, #tpu.memory_space<vmem>>, %arg3: memref<2x4x256xf32, #tpu.memory_space<vmem>>, %arg4: memref<8x4xf32, #tpu.memory_space<vmem>>, %arg5: memref<8x4xf32, #tpu.memory_space<vmem>>, %arg6: memref<8x1xf32, #tpu.memory_space<vmem>>, %arg7: memref<8x1xf32, #tpu.memory_space<vmem>>, %arg8: memref<1x1xf32, #tpu.memory_space<smem>>, %arg9: memref<2x4x256xf32, #tpu.memory_space<vmem>>) attributes {dimension_semantics = [#tpu.dimension_semantics<parallel>, #tpu.dimension_semantics<parallel>], iteration_bounds = array<i64: 1, 1>, scalar_prefetch = 0 : i64, scratch_operands = 0 : i64, tpu.core_type = #tpu.core_type<tc>, window_params = [{transform_indices = @transform_0, window_bounds = array<i64: 2, 4, 256>}, {transform_indices = @transform_1, window_bounds = array<i64: 2, 4, 256>}, {pipeline_mode = #tpu.pipeline_mode<synchronous>, transform_indices = @transform_2, window_bounds = array<i64: 8, 4>}, {pipeline_mode = #tpu.pipeline_mode<synchronous>, transform_indices = @transform_3, window_bounds = array<i64: 8, 4>}, {pipeline_mode = #tpu.pipeline_mode<synchronous>, transform_indices = @transform_4, window_bounds = array<i64: 8, 1>}, {pipeline_mode = #tpu.pipeline_mode<synchronous>, transform_indices = @transform_5, window_bounds = array<i64: 8, 1>}, {transform_indices = @transform_6, window_bounds = array<i64: 1, 1>}, {transform_indices = @transform_7, window_bounds = array<i64: 2, 4, 256>}]} {
    %c0 = arith.constant 0 : index
    %c0_0 = arith.constant 0 : index
    %0 = vector.load %arg4[%c0, %c0_0] : memref<8x4xf32, #tpu.memory_space<vmem>>, vector<8x4xf32>
    %c0_1 = arith.constant 0 : index
    %c0_2 = arith.constant 0 : index
    %1 = vector.load %arg5[%c0_1, %c0_2] : memref<8x4xf32, #tpu.memory_space<vmem>>, vector<8x4xf32>
    %c0_3 = arith.constant 0 : index
    %c0_4 = arith.constant 0 : index
    %2 = vector.load %arg6[%c0_3, %c0_4] : memref<8x1xf32, #tpu.memory_space<vmem>>, vector<8x1xf32>
    %c0_5 = arith.constant 0 : index
    %c0_6 = arith.constant 0 : index
    %3 = vector.load %arg7[%c0_5, %c0_6] : memref<8x1xf32, #tpu.memory_space<vmem>>, vector<8x1xf32>
    %c0_7 = arith.constant 0 : index
    %c0_8 = arith.constant 0 : index
    %4 = memref.load %arg8[%c0_7, %c0_8] : memref<1x1xf32, #tpu.memory_space<smem>>
    %c0_9 = arith.constant 0 : index
    %c0_10 = arith.constant 0 : index
    %c0_11 = arith.constant 0 : index
    %5 = vector.load %arg2[%c0_9, %c0_10, %c0_11] : memref<2x4x256xf32, #tpu.memory_space<vmem>>, vector<1x4x256xf32>
    %6 = vector.shape_cast %5 : vector<1x4x256xf32> to vector<4x256xf32>
    %c0_12 = arith.constant 0 : index
    %c0_13 = arith.constant 0 : index
    %c0_14 = arith.constant 0 : index
    %7 = vector.load %arg3[%c0_12, %c0_13, %c0_14] : memref<2x4x256xf32, #tpu.memory_space<vmem>>, vector<1x4x256xf32>
    %8 = vector.shape_cast %7 : vector<1x4x256xf32> to vector<4x256xf32>
    %cst = arith.constant dense<0.000000e+00> : vector<8x256xf32>
    %9 = tpu.matmul %0, %6, %cst {dimension_numbers = #tpu.dot_dimension_numbers<[1], [0], [0], [1], [0, 0, 1, 1], [], []>} : vector<8x4xf32>, vector<4x256xf32>, vector<8x256xf32> -> vector<8x256xf32>
    %cst_15 = arith.constant dense<0.000000e+00> : vector<8x256xf32>
    %10 = tpu.matmul %1, %8, %cst_15 {dimension_numbers = #tpu.dot_dimension_numbers<[1], [0], [0], [1], [0, 0, 1, 1], [], []>} : vector<8x4xf32>, vector<4x256xf32>, vector<8x256xf32> -> vector<8x256xf32>
    %11 = arith.addf %9, %10 : vector<8x256xf32>
    %12 = vector.broadcast %2 : vector<8x1xf32> to vector<8x256xf32>
    %13 = arith.addf %11, %12 : vector<8x256xf32>
    %cst_16 = arith.constant 0.000000e+00 : f32
    %14 = vector.broadcast %cst_16 : f32 to vector<8x256xf32>
    %15 = arith.maximumf %13, %14 : vector<8x256xf32>
    %16 = vector.broadcast %3 : vector<8x1xf32> to vector<8x256xf32>
    %17 = arith.mulf %15, %16 : vector<8x256xf32>
    %cst_17 = arith.constant dense<0.000000e+00> : vector<256xf32>
    %18 = vector.multi_reduction <add>, %17, %cst_17 [0] : vector<8x256xf32> to vector<256xf32>
    %19 = vector.shape_cast %18 : vector<256xf32> to vector<1x256xf32>
    %20 = vector.broadcast %4 : f32 to vector<1x256xf32>
    %21 = arith.addf %19, %20 : vector<1x256xf32>
    %22 = arith.negf %21 : vector<1x256xf32>
    %23 = math.exp %22 : vector<1x256xf32>
    %cst_18 = arith.constant 1.000000e+00 : f32
    %24 = vector.broadcast %cst_18 : f32 to vector<1x256xf32>
    %25 = arith.addf %24, %23 : vector<1x256xf32>
    %26 = arith.divf %24, %25 : vector<1x256xf32>
    %27 = vector.broadcast %26 : vector<1x256xf32> to vector<4x256xf32>
    %28 = arith.mulf %6, %27 : vector<4x256xf32>
    %c0_19 = arith.constant 0 : index
    %c0_20 = arith.constant 0 : index
    %c0_21 = arith.constant 0 : index
    %29 = vector.load %arg9[%c0_19, %c0_20, %c0_21] : memref<2x4x256xf32, #tpu.memory_space<vmem>>, vector<1x4x256xf32>
    %30 = vector.shape_cast %29 : vector<1x4x256xf32> to vector<4x256xf32>
    %31 = vector.shape_cast %28 : vector<4x256xf32> to vector<1x4x256xf32>
    tpu.vector_store %arg9[%c0_19, %c0_20, %c0_21], %31 {strides = array<i32>} : memref<2x4x256xf32, #tpu.memory_space<vmem>>, vector<1x4x256xf32>,
    %c1 = arith.constant 1 : index
    %c0_22 = arith.constant 0 : index
    %c0_23 = arith.constant 0 : index
    %32 = vector.load %arg2[%c1, %c0_22, %c0_23] : memref<2x4x256xf32, #tpu.memory_space<vmem>>, vector<1x4x256xf32>
    %33 = vector.shape_cast %32 : vector<1x4x256xf32> to vector<4x256xf32>
    %c1_24 = arith.constant 1 : index
    %c0_25 = arith.constant 0 : index
    %c0_26 = arith.constant 0 : index
    %34 = vector.load %arg3[%c1_24, %c0_25, %c0_26] : memref<2x4x256xf32, #tpu.memory_space<vmem>>, vector<1x4x256xf32>
    %35 = vector.shape_cast %34 : vector<1x4x256xf32> to vector<4x256xf32>
    %cst_27 = arith.constant dense<0.000000e+00> : vector<8x256xf32>
    %36 = tpu.matmul %0, %33, %cst_27 {dimension_numbers = #tpu.dot_dimension_numbers<[1], [0], [0], [1], [0, 0, 1, 1], [], []>} : vector<8x4xf32>, vector<4x256xf32>, vector<8x256xf32> -> vector<8x256xf32>
    %cst_28 = arith.constant dense<0.000000e+00> : vector<8x256xf32>
    %37 = tpu.matmul %1, %35, %cst_28 {dimension_numbers = #tpu.dot_dimension_numbers<[1], [0], [0], [1], [0, 0, 1, 1], [], []>} : vector<8x4xf32>, vector<4x256xf32>, vector<8x256xf32> -> vector<8x256xf32>
    %38 = arith.addf %36, %37 : vector<8x256xf32>
    %39 = vector.broadcast %2 : vector<8x1xf32> to vector<8x256xf32>
    %40 = arith.addf %38, %39 : vector<8x256xf32>
    %cst_29 = arith.constant 0.000000e+00 : f32
    %41 = vector.broadcast %cst_29 : f32 to vector<8x256xf32>
    %42 = arith.maximumf %40, %41 : vector<8x256xf32>
    %43 = vector.broadcast %3 : vector<8x1xf32> to vector<8x256xf32>
    %44 = arith.mulf %42, %43 : vector<8x256xf32>
    %cst_30 = arith.constant dense<0.000000e+00> : vector<256xf32>
    %45 = vector.multi_reduction <add>, %44, %cst_30 [0] : vector<8x256xf32> to vector<256xf32>
    %46 = vector.shape_cast %45 : vector<256xf32> to vector<1x256xf32>
    %47 = vector.broadcast %4 : f32 to vector<1x256xf32>
    %48 = arith.addf %46, %47 : vector<1x256xf32>
    %49 = arith.negf %48 : vector<1x256xf32>
    %50 = math.exp %49 : vector<1x256xf32>
    %cst_31 = arith.constant 1.000000e+00 : f32
    %51 = vector.broadcast %cst_31 : f32 to vector<1x256xf32>
    %52 = arith.addf %51, %50 : vector<1x256xf32>
    %53 = arith.divf %51, %52 : vector<1x256xf32>
    %54 = vector.broadcast %53 : vector<1x256xf32> to vector<4x256xf32>
    %55 = arith.mulf %33, %54 : vector<4x256xf32>
    %c1_32 = arith.constant 1 : index
    %c0_33 = arith.constant 0 : index
    %c0_34 = arith.constant 0 : index
    %56 = vector.load %arg9[%c1_32, %c0_33, %c0_34] : memref<2x4x256xf32, #tpu.memory_space<vmem>>, vector<1x4x256xf32>
    %57 = vector.shape_cast %56 : vector<1x4x256xf32> to vector<4x256xf32>
    %58 = vector.shape_cast %55 : vector<4x256xf32> to vector<1x4x256xf32>
    tpu.vector_store %arg9[%c1_32, %c0_33, %c0_34], %58 {strides = array<i32>} : memref<2x4x256xf32, #tpu.memory_space<vmem>>, vector<1x4x256xf32>,
    return
  }
  func.func @transform_0(%arg0: i32, %arg1: i32) -> (i32, i32, i32) {
    %c0_i32 = arith.constant 0 : i32
    %c0_i32_0 = arith.constant 0 : i32
    return %arg0, %c0_i32, %arg1 : i32, i32, i32
  }
  func.func @transform_1(%arg0: i32, %arg1: i32) -> (i32, i32, i32) {
    %c0_i32 = arith.constant 0 : i32
    %c0_i32_0 = arith.constant 0 : i32
    return %arg0, %c0_i32, %arg1 : i32, i32, i32
  }
  func.func @transform_2(%arg0: i32, %arg1: i32) -> (i32, i32) {
    %c0_i32 = arith.constant 0 : i32
    %c0_i32_0 = arith.constant 0 : i32
    %c0_i32_1 = arith.constant 0 : i32
    return %c0_i32, %c0_i32_0 : i32, i32
  }
  func.func @transform_3(%arg0: i32, %arg1: i32) -> (i32, i32) {
    %c0_i32 = arith.constant 0 : i32
    %c0_i32_0 = arith.constant 0 : i32
    %c0_i32_1 = arith.constant 0 : i32
    return %c0_i32, %c0_i32_0 : i32, i32
  }
  func.func @transform_4(%arg0: i32, %arg1: i32) -> (i32, i32) {
    %c0_i32 = arith.constant 0 : i32
    %c0_i32_0 = arith.constant 0 : i32
    %c0_i32_1 = arith.constant 0 : i32
    return %c0_i32, %c0_i32_0 : i32, i32
  }
  func.func @transform_5(%arg0: i32, %arg1: i32) -> (i32, i32) {
    %c0_i32 = arith.constant 0 : i32
    %c0_i32_0 = arith.constant 0 : i32
    %c0_i32_1 = arith.constant 0 : i32
    return %c0_i32, %c0_i32_0 : i32, i32
  }
  func.func @transform_6(%arg0: i32, %arg1: i32) -> (i32, i32) {
    %c0_i32 = arith.constant 0 : i32
    %c0_i32_0 = arith.constant 0 : i32
    %c0_i32_1 = arith.constant 0 : i32
    return %c0_i32, %c0_i32_0 : i32, i32
  }
  func.func @transform_7(%arg0: i32, %arg1: i32) -> (i32, i32, i32) {
    %c0_i32 = arith.constant 0 : i32
    %c0_i32_0 = arith.constant 0 : i32
    return %arg0, %c0_i32, %arg1 : i32, i32, i32
  }
}

</mosaic_0001>

<bundles_post_ra>
// kernel: tpu_custom_call.1
= control target key start
LH: loop header
LB: loop body
LE: loop exit
PB: predicated region body
PF: predicated region fallthrough
CT: control target
= control target key end

     0   :  { %13 = vsyncpa [#allocation4], 0  ;;  %s627_s0 = inlined_call_operand.vmem [shape: f32[2,4,256], index: 0, kind: input, shape index: {}]   ;;  %s628_s1 = inlined_call_operand.hbm [shape: f32[2,4,256], index: 1, kind: input, shape index: {}]   ;;  %s629_s2 = inlined_call_operand.vmem [shape: f32[8,4], index: 2, kind: input, shape index: {}]   ;;  %s630_s3 = inlined_call_operand.vmem [shape: f32[8,4], index: 3, kind: input, shape index: {}]   ;;  %s631_s4 = inlined_call_operand.vmem [shape: f32[8,1], index: 4, kind: input, shape index: {}]   ;;  %s632_s5 = inlined_call_operand.vmem [shape: f32[8,1], index: 5, kind: input, shape index: {}]   ;;  %s633_s6 = inlined_call_operand.<no memory space> [shape: f32[1,1], index: 6, kind: input, shape index: {}]   ;;  %s634_s7 = inlined_call_operand.hbm [shape: f32[2,4,256], index: 7, kind: output, shape index: {}]  }
   0x1   :  { %14 = vsyncpa [#allocation5], 0  ;;  %s21_s26 = sshll.u32 %s628_s1, 4  ;;  %s511_s27 = smov [#allocation3]   ;;  %s22_s26 = int_to_ptr.hbm [resolvable:$true] %s21_s26 }
   0x2   :  { %s23_s28 = sshll.u32 %s511_s27, 4  ;;  %s512_s29 = smov 128   ;;  %s24_s28 = int_to_ptr.vmem [resolvable:$true] %s23_s28 }
   0x3   :  { %s513_s30 = smov 8  }
   0x4   :  { %29 = dma.hbm_to_vmem [thread:$0]  %s22_s26, 256, %s24_s28, [#allocation4], %s512_s29, %s512_s29, %s513_s30  }
   0x5   :  { %507 = dma.done.wait [#allocation4], 256  }
   0x6   :  { %508 = vsyncadd [#allocation4], 4294967040  ;;  %v514_v0 = vmov 0   ;;  %v50_v1 = vld [vmem:[#allocation3] sm:$0xff]  ;;  %v46_v2 = vld [vmem:[%s631_s4] sm:$0xff]  ;;  %vm59_vm0 = vcmask 1043456   ;;  %v183_v47 = vstv %s633_s6 }
   0x7   :  { %442 = vset.pattern.permute.xlu0 %v514_v0  ;;  %52 = vst [vmem:[#allocation1] ss:$2 sm:$0xff] %v50_v1  ;;  %v568_v3 = vld [vmem:[%s627_s0] sm:$0xff]  ;;  %vm55_vm1 = vcmask 31744   ;;  %v234_v8 = vld [vmem:[#allocation3 + $0x8] sm:$0xff]  ;;  %v591_v12 = vld [vmem:[%s627_s0 + $0x8] sm:$0xff] }
   0x8   :  { %157 = vperm.xlu0 %442, %v46_v2   ;;  %v45_v4 = vld [vmem:[%s630_s3] sm:$0xff]  ;;  %s515_s6 = smov [#allocation6]   ;;  %s403_s19 = sshll.u32 %s634_s7, 4  ;;  %s404_s19 = int_to_ptr.hbm [resolvable:$true] %s403_s19 }
   0x9   :  { %v47_v5 = vld [vmem:[%s632_s5] sm:$0xff]  ;;  %s401_s16 = sshll.u32 %s515_s6, 4  ;;  %s402_s16 = int_to_ptr.vmem [resolvable:$true] %s401_s16 }
   0xa   :  { %v44_v9 = vld [vmem:[%s629_s2] sm:$0xff] }
   0xe   :  { %v53_v6 = vld.sshfl [vmem:[#allocation1] sm:$0xff pattern:$0x75316420]  ;;  %v54_v7 = vld.sshfl [vmem:[#allocation1 + $0x8] sm:$0xff pattern:$0x75316420] }
   0xf   :  { %105 = vst [vmem:[#allocation1] ss:$2 sm:$0xff] %v568_v3  ;;  %416 = vmatpush.msk.msra.mxu0 %vm59_vm0, %v53_v6  ;;  %418 = vmatpush.msk.msra.mxu1 %vm59_vm0, %v54_v7 }
  0x10   :  { %417 = vmatmul.msk.f32.vlgmr.msra.gmra.mxu0 %vm55_vm1, %v45_v4  ;;  %419 = vmatmul.msk.f32.vlgmr.msra.gmra.mxu1 %vm55_vm1, %v45_v4 }
  0x11   :  { %166 = vperm.xlu0 %442, %v47_v5  }
  0x16   :  { %v106_v10 = vld.sshfl [vmem:[#allocation1] sm:$0xff pattern:$0x75316420]  ;;  %v107_v11 = vld.sshfl [vmem:[#allocation1 + $0x8] sm:$0xff pattern:$0x75316420] }
  0x17   :  { %420 = vmatpush.msk.msra.mxu2 %vm59_vm0, %v106_v10  ;;  %422 = vmatpush.msk.msra.mxu3 %vm59_vm0, %v107_v11  ;;  %236 = vst [vmem:[#allocation1] ss:$2 sm:$0xff] %v234_v8 }
  0x18   :  { %421 = vmatmul.msk.f32.vlgmr.msra.gmra.mxu2 %vm55_vm1, %v44_v9  ;;  %423 = vmatmul.msk.f32.vlgmr.msra.gmra.mxu3 %vm55_vm1, %v44_v9 }
  0x1e   :  { %v237_v13 = vld.sshfl [vmem:[#allocation1] sm:$0xff pattern:$0x75316420]  ;;  %v238_v14 = vld.sshfl [vmem:[#allocation1 + $0x8] sm:$0xff pattern:$0x75316420] }
  0x1f   :  { %284 = vst [vmem:[#allocation1] ss:$2 sm:$0xff] %v591_v12  ;;  %427 = vmatpush.msk.msrb.mxu0 %vm59_vm0, %v237_v13  ;;  %429 = vmatpush.msk.msrb.mxu1 %vm59_vm0, %v238_v14 }
  0x20   :  { %428 = vmatmul.msk.f32.vlgmr.msrb.gmra.mxu0 %vm55_vm1, %v45_v4  ;;  %430 = vmatmul.msk.f32.vlgmr.msrb.gmra.mxu1 %vm55_vm1, %v45_v4 }
  0x26   :  { %v285_v15 = vld.sshfl [vmem:[#allocation1] sm:$0xff pattern:$0x75316420]  ;;  %v286_v16 = vld.sshfl [vmem:[#allocation1 + $0x8] sm:$0xff pattern:$0x75316420] }
  0x27   :  { %431 = vmatpush.msk.msrb.mxu2 %vm59_vm0, %v285_v15  ;;  %433 = vmatpush.msk.msrb.mxu3 %vm59_vm0, %v286_v16 }
  0x28   :  { %432 = vmatmul.msk.f32.vlgmr.msrb.gmra.mxu2 %vm55_vm1, %v44_v9  ;;  %434 = vmatmul.msk.f32.vlgmr.msrb.gmra.mxu3 %vm55_vm1, %v44_v9 }
  0x7a   :  { %v158_v17 = vpop.permute.xlu0 %157 }
  0x83   :  { %v167_v26 = vpop.permute.xlu0 %166 }
  0x8d   :  { %v81_v18 = vpop.f32.mrf.mxu0  ;;  %v101_v19 = vpop.f32.mrf.mxu1 }
  0x9b   :  { %v132_v20 = vpop.f32.mrf.mxu2  ;;  %v152_v21 = vpop.f32.mrf.mxu3 }
  0x9c   :  { %v133_v22 = vadd.f32 %v132_v20, %v81_v18  ;;  %v153_v23 = vadd.f32 %v152_v21, %v101_v19 }
  0x9d   :  { %v260_v37 = vpop.f32.mrf.mxu0  ;;  %v280_v38 = vpop.f32.mrf.mxu1 }
  0x9e   :  { %v160_v24 = vadd.f32 %v158_v17, %v133_v22  ;;  %v161_v25 = vadd.f32 %v158_v17, %v153_v23 }
  0xa0   :  { %v162_v27 = vmax.f32 %v160_v24, 0.0  ;;  %v163_v28 = vmax.f32 %v161_v25, 0.0 }
  0xa2   :  { %v169_v29 = vmul.f32 %v167_v26, %v162_v27  ;;  %v170_v30 = vmul.f32 %v167_v26, %v163_v28 }
  0xa4   :  { %v171_v31 = vrot.slane %v169_v29, 4  ;;  %v177_v32 = vrot.slane %v170_v30, 4 }
  0xa6   :  { %v172_v33 = vadd.f32 %v171_v31, %v169_v29  ;;  %v178_v34 = vadd.f32 %v177_v32, %v170_v30 }
  0xa8   :  { %v173_v35 = vrot.slane %v172_v33, 2  ;;  %v179_v36 = vrot.slane %v178_v34, 2 }
  0xaa   :  { %v174_v39 = vadd.f32 %v173_v35, %v172_v33  ;;  %v180_v40 = vadd.f32 %v179_v36, %v178_v34 }
  0xab   :  { %v308_v41 = vpop.f32.mrf.mxu2  ;;  %v328_v42 = vpop.f32.mrf.mxu3 }
  0xac   :  { %v175_v43 = vrot.slane %v174_v39, 1  ;;  %v181_v44 = vrot.slane %v180_v40, 1  ;;  %v309_v45 = vadd.f32 %v308_v41, %v260_v37  ;;  %v329_v46 = vadd.f32 %v328_v42, %v280_v38 }
  0xae   :  { %v176_v48 = vadd.f32 %v175_v43, %v174_v39  ;;  %v182_v49 = vadd.f32 %v181_v44, %v180_v40  ;;  %v331_v50 = vadd.f32 %v309_v45, %v158_v17  ;;  %v332_v51 = vadd.f32 %v329_v46, %v158_v17 }
  0xb0   :  { %v184_v52 = vadd.f32 %v183_v47, %v176_v48  ;;  %v185_v53 = vadd.f32 %v183_v47, %v182_v49  ;;  %v333_v54 = vmax.f32 %v331_v50, 0.0  ;;  %v334_v55 = vmax.f32 %v332_v51, 0.0 }
  0xb2   :  { %v424_v56 = vmul.f32 -1.442695, %v184_v52  ;;  %v425_v57 = vmul.f32 -1.442695, %v185_v53  ;;  %v335_v58 = vmul.f32 %v333_v54, %v167_v26  ;;  %v336_v59 = vmul.f32 %v334_v55, %v167_v26 }
  0xb4   :  { %443 = vpow2.f32 %v424_v56  ;;  %v337_v60 = vrot.slane %v335_v58, 4  ;;  %v343_v61 = vrot.slane %v336_v59, 4 }
  0xb5   :  { %445 = vpow2.f32 %v425_v57 }
  0xb6   :  { %v338_v62 = vadd.f32 %v337_v60, %v335_v58  ;;  %v344_v63 = vadd.f32 %v343_v61, %v336_v59 }
  0xb8   :  { %v339_v0 = vrot.slane %v338_v62, 2  ;;  %v345_v1 = vrot.slane %v344_v63, 2 }
  0xba   :  { %v444_v2 = vpop.eup %443  ;;  %v340_v4 = vadd.f32 %v339_v0, %v338_v62  ;;  %v346_v5 = vadd.f32 %v345_v1, %v344_v63 }
  0xbb   :  { %v446_v6 = vpop.eup %445  ;;  %v192_v7 = vadd.f32 1.0, %v444_v2 }
  0xbc   :  { %v193_v8 = vadd.f32 1.0, %v446_v6  ;;  %v341_v9 = vrot.slane %v340_v4, 1  ;;  %v347_v10 = vrot.slane %v346_v5, 1 }
  0xbd   :  { %447 = vrcp.f32 %v192_v7  ;;  %vm199_vm4 = vweird.f32 %v192_v7  ;;  %v205_v30 = vand.u32 2147483648, %v192_v7  ;;  %v203_v34 = vand.u32 2147483647, %v192_v7 }
  0xbe   :  { %449 = vrcp.f32 %v193_v8  ;;  %v342_v11 = vadd.f32 %v341_v9, %v340_v4  ;;  %v348_v13 = vadd.f32 %v347_v10, %v346_v5  ;;  %v220_v25 = vand.u32 2147483648, %v193_v8 }
  0xbf   :  { %v218_v27 = vand.u32 2147483647, %v193_v8  ;;  %vm214_vm6 = vweird.f32 %v193_v8  ;;  %v206_v40 = vor.u32 1.1754944e-38, %v205_v30  ;;  %vm204_vm9 = vcmp.eq.f32.partialorder %v203_v34, 8.507059e+37 }
  0xc0   :  { %v349_v14 = vadd.f32 %v342_v11, %v183_v47  ;;  %v350_v15 = vadd.f32 %v348_v13, %v183_v47  ;;  %v221_v37 = vor.u32 1.1754944e-38, %v220_v25 }
  0xc1   :  { %vm219_vm8 = vcmp.eq.f32.partialorder %v218_v27, 8.507059e+37 }
  0xc2   :  { %v435_v16 = vmul.f32 -1.442695, %v349_v14  ;;  %v436_v17 = vmul.f32 -1.442695, %v350_v15 }
  0xc3   :  { %v448_v18 = vpop.eup %447 }
  0xc4   :  { %v450_v19 = vpop.eup %449  ;;  %451 = vpow2.f32 %v435_v16  ;;  %v195_v20 = vmul.f32 %v448_v18, %v192_v7  ;;  %vm200_vm2 = vweird.f32 %v448_v18 }
  0xc5   :  { %453 = vpow2.f32 %v436_v17  ;;  %v210_v21 = vmul.f32 %v450_v19, %v193_v8  ;;  %vm215_vm3 = vweird.f32 %v450_v19  ;;  %vm605_vm5 = vmor %vm199_vm4, %vm200_vm2 }
  0xc6   :  { %v196_v22 = vsub.f32 1.0, %v195_v20  ;;  %vm216_vm7 = vmor %vm214_vm6, %vm215_vm3 }
  0xc7   :  { %v211_v23 = vsub.f32 1.0, %v210_v21 }
  0xc8   :  { %v197_v24 = vmul.f32 %v448_v18, %v196_v22 }
  0xc9   :  { %v212_v26 = vmul.f32 %v450_v19, %v211_v23 }
  0xca   :  { %v452_v28 = vpop.eup %451  ;;  %v198_v29 = vadd.f32 %v448_v18, %v197_v24 }
  0xcb   :  { %v454_v31 = vpop.eup %453  ;;  %v357_v32 = vadd.f32 1.0, %v452_v28  ;;  %v213_v35 = vadd.f32 %v450_v19, %v212_v26 }
  0xcc   :  { %v358_v36 = vadd.f32 1.0, %v454_v31  ;;  %v202_v38 = vsel %vm605_vm5, %v448_v18, %v198_v29 }
  0xcd   :  { %455 = vrcp.f32 %v357_v32  ;;  %v217_v39 = vsel %vm216_vm7, %v450_v19, %v213_v35  ;;  %v207_v43 = vsel %vm204_vm9, %v206_v40, %v202_v38  ;;  %vm364_vm12 = vweird.f32 %v357_v32 }
  0xce   :  { %457 = vrcp.f32 %v358_v36  ;;  %v222_v41 = vsel %vm219_vm8, %v221_v37, %v217_v39  ;;  %v385_v53 = vand.u32 2147483648, %v358_v36  ;;  %v383_v55 = vand.u32 2147483647, %v358_v36 }
  0xcf   :  { %v226_v42 = vrot.slane %v222_v41, 4  ;;  %v370_v57 = vand.u32 2147483648, %v357_v32  ;;  %vm379_vm14 = vweird.f32 %v358_v36 }
  0xd0   :  { %v386_v60 = vor.u32 1.1754944e-38, %v385_v53  ;;  %vm384_vm1 = vcmp.eq.f32.partialorder %v383_v55, 8.507059e+37 }
  0xd1   :  { %v227_v44 = vsel %vm59_vm0, %v207_v43, %v226_v42  ;;  %v371_v63 = vor.u32 1.1754944e-38, %v370_v57 }
  0xd2   :  { %v229_v45 = vmul.f32 %v227_v44, %v568_v3  ;;  %v368_v3 = vand.u32 2147483647, %v357_v32 }
  0xd3   :  { %v456_v46 = vpop.eup %455 }
  0xd4   :  { %v458_v47 = vpop.eup %457  ;;  %230 = vst [vmem:[#allocation6] sm:$0xff] %v229_v45  ;;  %v360_v48 = vmul.f32 %v456_v46, %v357_v32  ;;  %vm365_vm10 = vweird.f32 %v456_v46  ;;  %vm369_vm2 = vcmp.eq.f32.partialorder %v368_v3, 8.507059e+37 }
  0xd5   :  { %v375_v49 = vmul.f32 %v458_v47, %v358_v36  ;;  %vm380_vm11 = vweird.f32 %v458_v47  ;;  %vm613_vm13 = vmor %vm364_vm12, %vm365_vm10 }
  0xd6   :  { %v361_v50 = vsub.f32 1.0, %v360_v48  ;;  %vm381_vm15 = vmor %vm379_vm14, %vm380_vm11 }
  0xd7   :  { %v376_v51 = vsub.f32 1.0, %v375_v49 }
  0xd8   :  { %v362_v52 = vmul.f32 %v456_v46, %v361_v50 }
  0xd9   :  { %v377_v54 = vmul.f32 %v458_v47, %v376_v51 }
  0xda   :  { %v363_v56 = vadd.f32 %v456_v46, %v362_v52 }
  0xdb   :  { %v378_v59 = vadd.f32 %v458_v47, %v377_v54 }
  0xdc   :  { %v367_v61 = vsel %vm613_vm13, %v456_v46, %v363_v56 }
  0xdd   :  { %v382_v62 = vsel %vm381_vm15, %v458_v47, %v378_v59  ;;  %v372_v2 = vsel %vm369_vm2, %v371_v63, %v367_v61 }
  0xde   :  { %v387_v0 = vsel %vm384_vm1, %v386_v60, %v382_v62 }
  0xdf   :  { %v391_v1 = vrot.slane %v387_v0, 4 }
  0xe1   :  { %v392_v4 = vsel %vm59_vm0, %v372_v2, %v391_v1 }
  0xe2   :  { %v394_v5 = vmul.f32 %v591_v12, %v392_v4 }
  0xe4   :  { %396 = vst [vmem:[#allocation6 + $0x8] sm:$0xff] %v394_v5 }
  0xe5   :  { %409 = dma.vmem_to_hbm [thread:$0]  %s402_s16, 256, %s404_s19, [#allocation5], %s512_s29, %s512_s29, %s513_s30  }
  0xe6   :  { %509 = dma.done.wait [#allocation5], 256  }
  0xe7   :  { %510 = vsyncadd [#allocation5], 4294967040 }
  0xe8   :  { %414 = vsyncpa [#allocation4], 1 }
  0xe9   :  { %415 = vsyncpa [#allocation5], 1 }

// kernel: tpu_custom_call.1
= control target key start
LH: loop header
LB: loop body
LE: loop exit
PB: predicated region body
PF: predicated region fallthrough
CT: control target
= control target key end

     0   :  { %13 = vsyncpa [#allocation4], 0  ;;  %s627_s0 = inlined_call_operand.vmem [shape: f32[2,4,256], index: 0, kind: input, shape index: {}]   ;;  %s628_s1 = inlined_call_operand.hbm [shape: f32[2,4,256], index: 1, kind: input, shape index: {}]   ;;  %s629_s2 = inlined_call_operand.vmem [shape: f32[8,4], index: 2, kind: input, shape index: {}]   ;;  %s630_s3 = inlined_call_operand.vmem [shape: f32[8,4], index: 3, kind: input, shape index: {}]   ;;  %s631_s4 = inlined_call_operand.vmem [shape: f32[8,1], index: 4, kind: input, shape index: {}]   ;;  %s632_s5 = inlined_call_operand.vmem [shape: f32[8,1], index: 5, kind: input, shape index: {}]   ;;  %s633_s6 = inlined_call_operand.<no memory space> [shape: f32[1,1], index: 6, kind: input, shape index: {}]   ;;  %s634_s7 = inlined_call_operand.hbm [shape: f32[2,4,256], index: 7, kind: output, shape index: {}]  }
   0x1   :  { %14 = vsyncpa [#allocation5], 0  ;;  %s21_s26 = sshll.u32 %s628_s1, 4  ;;  %s511_s27 = smov [#allocation3]   ;;  %s22_s26 = int_to_ptr.hbm [resolvable:$true] %s21_s26 }
   0x2   :  { %s23_s28 = sshll.u32 %s511_s27, 4  ;;  %s512_s29 = smov 128   ;;  %s24_s28 = int_to_ptr.vmem [resolvable:$true] %s23_s28 }
   0x3   :  { %s513_s30 = smov 8  }
   0x4   :  { %29 = dma.hbm_to_vmem [thread:$0]  %s22_s26, 256, %s24_s28, [#allocation4], %s512_s29, %s512_s29, %s513_s30  }
   0x5   :  { %507 = dma.done.wait [#allocation4], 256  }
   0x6   :  { %508 = vsyncadd [#allocation4], 4294967040  ;;  %v514_v0 = vmov 0   ;;  %v50_v1 = vld [vmem:[#allocation3] sm:$0xff]  ;;  %v46_v2 = vld [vmem:[%s631_s4] sm:$0xff]  ;;  %vm59_vm0 = vcmask 1043456   ;;  %v183_v47 = vstv %s633_s6 }
   0x7   :  { %442 = vset.pattern.permute.xlu0 %v514_v0  ;;  %52 = vst [vmem:[#allocation1] ss:$2 sm:$0xff] %v50_v1  ;;  %v568_v3 = vld [vmem:[%s627_s0] sm:$0xff]  ;;  %vm55_vm1 = vcmask 31744   ;;  %v234_v8 = vld [vmem:[#allocation3 + $0x8] sm:$0xff]  ;;  %v591_v12 = vld [vmem:[%s627_s0 + $0x8] sm:$0xff] }
   0x8   :  { %157 = vperm.xlu0 %442, %v46_v2   ;;  %v45_v4 = vld [vmem:[%s630_s3] sm:$0xff]  ;;  %s515_s6 = smov [#allocation6]   ;;  %s403_s19 = sshll.u32 %s634_s7, 4  ;;  %s404_s19 = int_to_ptr.hbm [resolvable:$true] %s403_s19 }
   0x9   :  { %v47_v5 = vld [vmem:[%s632_s5] sm:$0xff]  ;;  %s401_s16 = sshll.u32 %s515_s6, 4  ;;  %s402_s16 = int_to_ptr.vmem [resolvable:$true] %s401_s16 }
   0xa   :  { %v44_v9 = vld [vmem:[%s629_s2] sm:$0xff] }
   0xe   :  { %v53_v6 = vld.sshfl [vmem:[#allocation1] sm:$0xff pattern:$0x75316420]  ;;  %v54_v7 = vld.sshfl [vmem:[#allocation1 + $0x8] sm:$0xff pattern:$0x75316420] }
   0xf   :  { %105 = vst [vmem:[#allocation1] ss:$2 sm:$0xff] %v568_v3  ;;  %416 = vmatpush.msk.msra.mxu0 %vm59_vm0, %v53_v6  ;;  %418 = vmatpush.msk.msra.mxu1 %vm59_vm0, %v54_v7 }
  0x10   :  { %417 = vmatmul.msk.f32.vlgmr.msra.gmra.mxu0 %vm55_vm1, %v45_v4  ;;  %419 = vmatmul.msk.f32.vlgmr.msra.gmra.mxu1 %vm55_vm1, %v45_v4 }
  0x11   :  { %166 = vperm.xlu0 %442, %v47_v5  }
  0x16   :  { %v106_v10 = vld.sshfl [vmem:[#allocation1] sm:$0xff pattern:$0x75316420]  ;;  %v107_v11 = vld.sshfl [vmem:[#allocation1 + $0x8] sm:$0xff pattern:$0x75316420] }
  0x17   :  { %420 = vmatpush.msk.msra.mxu2 %vm59_vm0, %v106_v10  ;;  %422 = vmatpush.msk.msra.mxu3 %vm59_vm0, %v107_v11  ;;  %236 = vst [vmem:[#allocation1] ss:$2 sm:$0xff] %v234_v8 }
  0x18   :  { %421 = vmatmul.msk.f32.vlgmr.msra.gmra.mxu2 %vm55_vm1, %v44_v9  ;;  %423 = vmatmul.msk.f32.vlgmr.msra.gmra.mxu3 %vm55_vm1, %v44_v9 }
  0x1e   :  { %v237_v13 = vld.sshfl [vmem:[#allocation1] sm:$0xff pattern:$0x75316420]  ;;  %v238_v14 = vld.sshfl [vmem:[#allocation1 + $0x8] sm:$0xff pattern:$0x75316420] }
  0x1f   :  { %284 = vst [vmem:[#allocation1] ss:$2 sm:$0xff] %v591_v12  ;;  %427 = vmatpush.msk.msrb.mxu0 %vm59_vm0, %v237_v13  ;;  %429 = vmatpush.msk.msrb.mxu1 %vm59_vm0, %v238_v14 }
  0x20   :  { %428 = vmatmul.msk.f32.vlgmr.msrb.gmra.mxu0 %vm55_vm1, %v45_v4  ;;  %430 = vmatmul.msk.f32.vlgmr.msrb.gmra.mxu1 %vm55_vm1, %v45_v4 }
  0x26   :  { %v285_v15 = vld.sshfl [vmem:[#allocation1] sm:$0xff pattern:$0x75316420]  ;;  %v286_v16 = vld.sshfl [vmem:[#allocation1 + $0x8] sm:$0xff pattern:$0x75316420] }
  0x27   :  { %431 = vmatpush.msk.msrb.mxu2 %vm59_vm0, %v285_v15  ;;  %433 = vmatpush.msk.msrb.mxu3 %vm59_vm0, %v286_v16 }
  0x28   :  { %432 = vmatmul.msk.f32.vlgmr.msrb.gmra.mxu2 %vm55_vm1, %v44_v9  ;;  %434 = vmatmul.msk.f32.vlgmr.msrb.gmra.mxu3 %vm55_vm1, %v44_v9 }
  0x7a   :  { %v158_v17 = vpop.permute.xlu0 %157 }
  0x83   :  { %v167_v26 = vpop.permute.xlu0 %166 }
  0x8d   :  { %v81_v18 = vpop.f32.mrf.mxu0  ;;  %v101_v19 = vpop.f32.mrf.mxu1 }
  0x9b   :  { %v132_v20 = vpop.f32.mrf.mxu2  ;;  %v152_v21 = vpop.f32.mrf.mxu3 }
  0x9c   :  { %v133_v22 = vadd.f32 %v132_v20, %v81_v18  ;;  %v153_v23 = vadd.f32 %v152_v21, %v101_v19 }
  0x9d   :  { %v260_v37 = vpop.f32.mrf.mxu0  ;;  %v280_v38 = vpop.f32.mrf.mxu1 }
  0x9e   :  { %v160_v24 = vadd.f32 %v158_v17, %v133_v22  ;;  %v161_v25 = vadd.f32 %v158_v17, %v153_v23 }
  0xa0   :  { %v162_v27 = vmax.f32 %v160_v24, 0.0  ;;  %v163_v28 = vmax.f32 %v161_v25, 0.0 }
  0xa2   :  { %v169_v29 = vmul.f32 %v167_v26, %v162_v27  ;;  %v170_v30 = vmul.f32 %v167_v26, %v163_v28 }
  0xa4   :  { %v171_v31 = vrot.slane %v169_v29, 4  ;;  %v177_v32 = vrot.slane %v170_v30, 4 }
  0xa6   :  { %v172_v33 = vadd.f32 %v171_v31, %v169_v29  ;;  %v178_v34 = vadd.f32 %v177_v32, %v170_v30 }
  0xa8   :  { %v173_v35 = vrot.slane %v172_v33, 2  ;;  %v179_v36 = vrot.slane %v178_v34, 2 }
  0xaa   :  { %v174_v39 = vadd.f32 %v173_v35, %v172_v33  ;;  %v180_v40 = vadd.f32 %v179_v36, %v178_v34 }
  0xab   :  { %v308_v41 = vpop.f32.mrf.mxu2  ;;  %v328_v42 = vpop.f32.mrf.mxu3 }
  0xac   :  { %v175_v43 = vrot.slane %v174_v39, 1  ;;  %v181_v44 = vrot.slane %v180_v40, 1  ;;  %v309_v45 = vadd.f32 %v308_v41, %v260_v37  ;;  %v329_v46 = vadd.f32 %v328_v42, %v280_v38 }
  0xae   :  { %v176_v48 = vadd.f32 %v175_v43, %v174_v39  ;;  %v182_v49 = vadd.f32 %v181_v44, %v180_v40  ;;  %v331_v50 = vadd.f32 %v309_v45, %v158_v17  ;;  %v332_v51 = vadd.f32 %v329_v46, %v158_v17 }
  0xb0   :  { %v184_v52 = vadd.f32 %v183_v47, %v176_v48  ;;  %v185_v53 = vadd.f32 %v183_v47, %v182_v49  ;;  %v333_v54 = vmax.f32 %v331_v50, 0.0  ;;  %v334_v55 = vmax.f32 %v332_v51, 0.0 }
  0xb2   :  { %v424_v56 = vmul.f32 -1.442695, %v184_v52  ;;  %v425_v57 = vmul.f32 -1.442695, %v185_v53  ;;  %v335_v58 = vmul.f32 %v333_v54, %v167_v26  ;;  %v336_v59 = vmul.f32 %v334_v55, %v167_v26 }
  0xb4   :  { %443 = vpow2.f32 %v424_v56  ;;  %v337_v60 = vrot.slane %v335_v58, 4  ;;  %v343_v61 = vrot.slane %v336_v59, 4 }
  0xb5   :  { %445 = vpow2.f32 %v425_v57 }
  0xb6   :  { %v338_v62 = vadd.f32 %v337_v60, %v335_v58  ;;  %v344_v63 = vadd.f32 %v343_v61, %v336_v59 }
  0xb8   :  { %v339_v0 = vrot.slane %v338_v62, 2  ;;  %v345_v1 = vrot.slane %v344_v63, 2 }
  0xba   :  { %v444_v2 = vpop.eup %443  ;;  %v340_v4 = vadd.f32 %v339_v0, %v338_v62  ;;  %v346_v5 = vadd.f32 %v345_v1, %v344_v63 }
  0xbb   :  { %v446_v6 = vpop.eup %445  ;;  %v192_v7 = vadd.f32 1.0, %v444_v2 }
  0xbc   :  { %v193_v8 = vadd.f32 1.0, %v446_v6  ;;  %v341_v9 = vrot.slane %v340_v4, 1  ;;  %v347_v10 = vrot.slane %v346_v5, 1 }
  0xbd   :  { %447 = vrcp.f32 %v192_v7  ;;  %vm199_vm4 = vweird.f32 %v192_v7  ;;  %v205_v30 = vand.u32 2147483648, %v192_v7  ;;  %v203_v34 = vand.u32 2147483647, %v192_v7 }
  0xbe   :  { %449 = vrcp.f32 %v193_v8  ;;  %v342_v11 = vadd.f32 %v341_v9, %v340_v4  ;;  %v348_v13 = vadd.f32 %v347_v10, %v346_v5  ;;  %v220_v25 = vand.u32 2147483648, %v193_v8 }
  0xbf   :  { %v218_v27 = vand.u32 2147483647, %v193_v8  ;;  %vm214_vm6 = vweird.f32 %v193_v8  ;;  %v206_v40 = vor.u32 1.1754944e-38, %v205_v30  ;;  %vm204_vm9 = vcmp.eq.f32.partialorder %v203_v34, 8.507059e+37 }
  0xc0   :  { %v349_v14 = vadd.f32 %v342_v11, %v183_v47  ;;  %v350_v15 = vadd.f32 %v348_v13, %v183_v47  ;;  %v221_v37 = vor.u32 1.1754944e-38, %v220_v25 }
  0xc1   :  { %vm219_vm8 = vcmp.eq.f32.partialorder %v218_v27, 8.507059e+37 }
  0xc2   :  { %v435_v16 = vmul.f32 -1.442695, %v349_v14  ;;  %v436_v17 = vmul.f32 -1.442695, %v350_v15 }
  0xc3   :  { %v448_v18 = vpop.eup %447 }
  0xc4   :  { %v450_v19 = vpop.eup %449  ;;  %451 = vpow2.f32 %v435_v16  ;;  %v195_v20 = vmul.f32 %v448_v18, %v192_v7  ;;  %vm200_vm2 = vweird.f32 %v448_v18 }
  0xc5   :  { %453 = vpow2.f32 %v436_v17  ;;  %v210_v21 = vmul.f32 %v450_v19, %v193_v8  ;;  %vm215_vm3 = vweird.f32 %v450_v19  ;;  %vm605_vm5 = vmor %vm199_vm4, %vm200_vm2 }
  0xc6   :  { %v196_v22 = vsub.f32 1.0, %v195_v20  ;;  %vm216_vm7 = vmor %vm214_vm6, %vm215_vm3 }
  0xc7   :  { %v211_v23 = vsub.f32 1.0, %v210_v21 }
  0xc8   :  { %v197_v24 = vmul.f32 %v448_v18, %v196_v22 }
  0xc9   :  { %v212_v26 = vmul.f32 %v450_v19, %v211_v23 }
  0xca   :  { %v452_v28 = vpop.eup %451  ;;  %v198_v29 = vadd.f32 %v448_v18, %v197_v24 }
  0xcb   :  { %v454_v31 = vpop.eup %453  ;;  %v357_v32 = vadd.f32 1.0, %v452_v28  ;;  %v213_v35 = vadd.f32 %v450_v19, %v212_v26 }
  0xcc   :  { %v358_v36 = vadd.f32 1.0, %v454_v31  ;;  %v202_v38 = vsel %vm605_vm5, %v448_v18, %v198_v29 }
  0xcd   :  { %455 = vrcp.f32 %v357_v32  ;;  %v217_v39 = vsel %vm216_vm7, %v450_v19, %v213_v35  ;;  %v207_v43 = vsel %vm204_vm9, %v206_v40, %v202_v38  ;;  %vm364_vm12 = vweird.f32 %v357_v32 }
  0xce   :  { %457 = vrcp.f32 %v358_v36  ;;  %v222_v41 = vsel %vm219_vm8, %v221_v37, %v217_v39  ;;  %v385_v53 = vand.u32 2147483648, %v358_v36  ;;  %v383_v55 = vand.u32 2147483647, %v358_v36 }
  0xcf   :  { %v226_v42 = vrot.slane %v222_v41, 4  ;;  %v370_v57 = vand.u32 2147483648, %v357_v32  ;;  %vm379_vm14 = vweird.f32 %v358_v36 }
  0xd0   :  { %v386_v60 = vor.u32 1.1754944e-38, %v385_v53  ;;  %vm384_vm1 = vcmp.eq.f32.partialorder %v383_v55, 8.507059e+37 }
  0xd1   :  { %v227_v44 = vsel %vm59_vm0, %v207_v43, %v226_v42  ;;  %v371_v63 = vor.u32 1.1754944e-38, %v370_v57 }
  0xd2   :  { %v229_v45 = vmul.f32 %v227_v44, %v568_v3  ;;  %v368_v3 = vand.u32 2147483647, %v357_v32 }
  0xd3   :  { %v456_v46 = vpop.eup %455 }
  0xd4   :  { %v458_v47 = vpop.eup %457  ;;  %230 = vst [vmem:[#allocation6] sm:$0xff] %v229_v45  ;;  %v360_v48 = vmul.f32 %v456_v46, %v357_v32  ;;  %vm365_vm10 = vweird.f32 %v456_v46  ;;  %vm369_vm2 = vcmp.eq.f32.partialorder %v368_v3, 8.507059e+37 }
  0xd5   :  { %v375_v49 = vmul.f32 %v458_v47, %v358_v36  ;;  %vm380_vm11 = vweird.f32 %v458_v47  ;;  %vm613_vm13 = vmor %vm364_vm12, %vm365_vm10 }
  0xd6   :  { %v361_v50 = vsub.f32 1.0, %v360_v48  ;;  %vm381_vm15 = vmor %vm379_vm14, %vm380_vm11 }
  0xd7   :  { %v376_v51 = vsub.f32 1.0, %v375_v49 }
  0xd8   :  { %v362_v52 = vmul.f32 %v456_v46, %v361_v50 }
  0xd9   :  { %v377_v54 = vmul.f32 %v458_v47, %v376_v51 }
  0xda   :  { %v363_v56 = vadd.f32 %v456_v46, %v362_v52 }
  0xdb   :  { %v378_v59 = vadd.f32 %v458_v47, %v377_v54 }
  0xdc   :  { %v367_v61 = vsel %vm613_vm13, %v456_v46, %v363_v56 }
  0xdd   :  { %v382_v62 = vsel %vm381_vm15, %v458_v47, %v378_v59  ;;  %v372_v2 = vsel %vm369_vm2, %v371_v63, %v367_v61 }
  0xde   :  { %v387_v0 = vsel %vm384_vm1, %v386_v60, %v382_v62 }
  0xdf   :  { %v391_v1 = vrot.slane %v387_v0, 4 }
  0xe1   :  { %v392_v4 = vsel %vm59_vm0, %v372_v2, %v391_v1 }
  0xe2   :  { %v394_v5 = vmul.f32 %v591_v12, %v392_v4 }
  0xe4   :  { %396 = vst [vmem:[#allocation6 + $0x8] sm:$0xff] %v394_v5 }
  0xe5   :  { %409 = dma.vmem_to_hbm [thread:$0]  %s402_s16, 256, %s404_s19, [#allocation5], %s512_s29, %s512_s29, %s513_s30  }
  0xe6   :  { %509 = dma.done.wait [#allocation5], 256  }
  0xe7   :  { %510 = vsyncadd [#allocation5], 4294967040 }
  0xe8   :  { %414 = vsyncpa [#allocation4], 1 }
  0xe9   :  { %415 = vsyncpa [#allocation5], 1 }

</bundles_post_ra>
